<compile_context>
chip_gen: v7x
topology: tpu7x:2x2x1
jax: 0.10.0
libtpu: 0.0.40
codegen_flags: <defaults>
</compile_context>

<pallas_src>
import functools

import jax
import jax.numpy as jnp
from jax.experimental import pallas as pl
from jax.experimental.pallas import tpu as pltpu

LANE = 128
SUBLANE = 8
NUM_CORE_SPLITS = 2  # shard tiles across v7x's 2 TensorCores; harmless on v5e/v6e


# ----------------------------------------------------------------------------
# Kernel: per-core partial sums, accumulated as (8, 128) vreg slabs.
#   out block (1, 3, 8, 128):
#     [0] sum of BCE-with-logits terms
#     [1] sum(p * y)                      (p = sigmoid(x) or x)
#     [2] sum(p^2 + y^2)  (squared_pred)  or  sum(p + y)
# ----------------------------------------------------------------------------
def _dice_bce_sums_kernel(xr_ref, xt_ref, out_ref, *, tile_rows, tiles_per_core,
                          n_valid, squared_pred, use_sigmoid):
    c = pl.program_id(0)   # core-split axis ("parallel")
    i = pl.program_id(1)   # tile axis        ("arbitrary", accumulating)

    @pl.when(i == 0)
    def _():
        out_ref[...] = jnp.zeros_like(out_ref)

    x = xr_ref[...].astype(jnp.float32)
    y = xt_ref[...].astype(jnp.float32)

    # Element-validity mask: handles the cdiv tail tile, per-core dummy tiles and
    # any flatten padding.  (int32 element index; fine for < 2^31 elements.)
    row0 = (c * tiles_per_core + i) * tile_rows
    rid = jax.lax.broadcasted_iota(jnp.int32, (tile_rows, LANE), 0)
    lid = jax.lax.broadcasted_iota(jnp.int32, (tile_rows, LANE), 1)
    valid = (row0 + rid) * LANE + lid < n_valid

    # One exp per element, reused for BCE-with-logits and the stable sigmoid.
    e = jnp.exp(-jnp.abs(x))
    bce = jnp.maximum(x, 0.0) - x * y + jnp.log1p(e)
    if use_sigmoid:
        p = jnp.where(x >= 0.0, 1.0, e) / (1.0 + e)   # == sigmoid(x), no 2nd exp
    else:
        p = x

    bce = jnp.where(valid, bce, 0.0)
    p = jnp.where(valid, p, 0.0)
    y = jnp.where(valid, y, 0.0)

    denom_terms = (p * p + y * y) if squared_pred else (p + y)

    def fold(v):  # (tile_rows, 128) -> (8, 128): pure VALU vreg adds, no XLU.
        return jnp.sum(v.reshape(tile_rows // SUBLANE, SUBLANE, LANE), axis=0)

    acc = jnp.stack([fold(bce), fold(p * y), fold(denom_terms)])  # (3, 8, 128)
    out_ref[...] += acc[jnp.newaxis]


def _flatten_lane_dense(a):
    """Flatten to a (rows, 128) slab with rows a multiple of 8 (pads only if needed)."""
    n = a.size
    rows = pl.cdiv(n, LANE)
    rows = ((rows + SUBLANE - 1) // SUBLANE) * SUBLANE
    flat = a.reshape(-1)
    padded = rows * LANE
    if padded != n:
        flat = jnp.pad(flat, (0, padded - n))   # pad values are masked in-kernel
    return flat.reshape(rows, LANE), rows


def _dice_bce_partial_sums(y_pred, y_true, *, squared_pred, use_sigmoid, tile_rows):
    n = y_pred.size
    xr, rows = _flatten_lane_dense(y_pred)
    xt, _ = _flatten_lane_dense(y_true)

    # Tile: as large as fits comfortably (4096x128 f32 = 2 MiB; 2 inputs x 2
    # buffers = 8 MiB resident -> under every generation's scoped-VMEM default).
    tr = min(int(tile_rows), rows)
    tr = max(SUBLANE, (tr // SUBLANE) * SUBLANE)
    total_tiles = pl.cdiv(rows, tr)
    tiles_per_core = pl.cdiv(total_tiles, NUM_CORE_SPLITS)

    def in_map(c, i):
        # Clamp so dummy tiles (past the real data) re-read the last real block;
        # their contribution is zeroed by the validity mask.
        return (jnp.minimum(c * tiles_per_core + i, total_tiles - 1), 0)

    kernel = functools.partial(
        _dice_bce_sums_kernel, tile_rows=tr, tiles_per_core=tiles_per_core,
        n_valid=n, squared_pred=squared_pred, use_sigmoid=use_sigmoid)

    out = pl.pallas_call(
        kernel,
        out_shape=jax.ShapeDtypeStruct((NUM_CORE_SPLITS, 3, SUBLANE, LANE),
                                       jnp.float32),
        grid_spec=pltpu.PrefetchScalarGridSpec(
            num_scalar_prefetch=0,
            grid=(NUM_CORE_SPLITS, tiles_per_core),
            in_specs=[
                pl.BlockSpec((tr, LANE), in_map),
                pl.BlockSpec((tr, LANE), in_map),
            ],
            out_specs=pl.BlockSpec((1, 3, SUBLANE, LANE),
                                   lambda c, i: (c, 0, 0, 0)),
        ),
        compiler_params=pltpu.CompilerParams(
            dimension_semantics=("parallel", "arbitrary"),
            vmem_limit_bytes=32 * 1024 * 1024,
        ),
    )(xr, xt)

    # Tiny final reduce over (cores, sublanes, lanes); fuses under jit.
    return jnp.sum(out, axis=(0, 2, 3))  # shape (3,)


@functools.partial(jax.jit, static_argnames=("squared_pred", "use_sigmoid",
                                             "smooth_nr", "smooth_dr",
                                             "tile_rows"))
def dice_bce_with_logits_loss(y_pred, y_true, *, squared_pred=True,
                              use_sigmoid=True, smooth_nr=1.0, smooth_dr=1.0,
                              tile_rows=4096):
    sums = _dice_bce_partial_sums(y_pred, y_true, squared_pred=squared_pred,
                                  use_sigmoid=use_sigmoid, tile_rows=tile_rows)
    n = float(y_pred.size)
    bce_mean = sums[0] / n
    dice = 1.0 - (2.0 * sums[1] + smooth_nr) / (sums[2] + smooth_dr)
    return bce_mean + dice


class DiceBCEWithLogitsLossPallas:
    """Pallas TPU port of DiceBCEWithLogitsLoss (nn.BCEWithLogitsLoss mean + dice loss)."""

    def __init__(self, sigmoid=True, softmax=False, squared_pred=True,
                 smooth_nr=1.0, smooth_dr=1.0, tile_rows=4096):
        if softmax:
            # Matches the PyTorch module, which also raises for softmax=True.
            raise NotImplementedError("softmax activation is not implemented")
        self.use_sigmoid = bool(sigmoid)
        self.squared_pred = bool(squared_pred)
        self.smooth_nr = float(smooth_nr)
        self.smooth_dr = float(smooth_dr)
        self.tile_rows = int(tile_rows)

    def __call__(self, y_pred, y_true):
        assert y_pred.shape == y_true.shape
        return dice_bce_with_logits_loss(
            y_pred, y_true,
            squared_pred=self.squared_pred, use_sigmoid=self.use_sigmoid,
            smooth_nr=self.smooth_nr, smooth_dr=self.smooth_dr,
            tile_rows=self.tile_rows)


# ----------------------------------------------------------------------------
# Pure-JAX reference (mirrors the PyTorch module) for verification.
# ----------------------------------------------------------------------------
def _ref_dice_bce(y_pred, y_true, squared_pred=True, smooth_nr=1.0, smooth_dr=1.0):
    x = y_pred.astype(jnp.float32).ravel()
    y = y_true.astype(jnp.float32).ravel()
    bce = jnp.mean(jnp.maximum(x, 0.0) - x * y + jnp.log1p(jnp.exp(-jnp.abs(x))))
    p = jax.nn.sigmoid(x)
    num = 2.0 * jnp.sum(p * y) + smooth_nr
    if squared_pred:
        den = jnp.sum(p * p) + jnp.sum(y * y) + smooth_dr
    else:
        den = jnp.sum(p) + jnp.sum(y) + smooth_dr
    return bce + 1.0 - num / den


if __name__ == "__main__":
    key = jax.random.PRNGKey(0)
    k1, k2, k3, k4 = jax.random.split(key, 4)

    # Segmentation-style logits/targets, NCHW.
    B, C, H, W = 2, 4, 16, 16
    y_pred = jax.random.normal(k1, (B, C, H, W), dtype=jnp.float32)
    y_true = (jax.random.uniform(k2, (B, C, H, W)) > 0.5).astype(jnp.float32)

    loss_fn = DiceBCEWithLogitsLossPallas()
    loss = jax.block_until_ready(loss_fn(y_pred, y_true))
    ref = _ref_dice_bce(y_pred, y_true)
    assert jnp.allclose(loss, ref, rtol=1e-5, atol=1e-5), (loss, ref)

    # Ragged shape (size not a multiple of 1024) exercising the masked tail.
    yp2 = jax.random.normal(k3, (2, 3, 15, 13), dtype=jnp.float32)
    yt2 = (jax.random.uniform(k4, (2, 3, 15, 13)) > 0.5).astype(jnp.float32)
    loss2 = jax.block_until_ready(loss_fn(yp2, yt2))
    ref2 = _ref_dice_bce(yp2, yt2)
    assert jnp.allclose(loss2, ref2, rtol=1e-5, atol=1e-5), (loss2, ref2)

    print("KERNEL_OK")
</pallas_src>

<mosaic_0001>
module attributes {stable_mosaic.version = 11 : i64} {
  func.func @_dice_bce_sums_kernel(%arg0: i32, %arg1: i32, %arg2: memref<16x128xf32, #tpu.memory_space<vmem>>, %arg3: memref<16x128xf32, #tpu.memory_space<vmem>>, %arg4: memref<1x3x8x128xf32, #tpu.memory_space<vmem>>) attributes {dimension_semantics = [#tpu.dimension_semantics<parallel>, #tpu.dimension_semantics<arbitrary>], iteration_bounds = array<i64: 2, 1>, scalar_prefetch = 0 : i64, scratch_operands = 0 : i64, tpu.core_type = #tpu.core_type<tc>, window_params = [{transform_indices = @transform_0, window_bounds = array<i64: 16, 128>}, {transform_indices = @transform_1, window_bounds = array<i64: 16, 128>}, {transform_indices = @transform_2, window_bounds = array<i64: 1, 3, 8, 128>}]} {
    %c0_i32 = arith.constant 0 : i32
    %0 = arith.cmpi eq, %arg1, %c0_i32 : i32
    %1 = arith.extui %0 : i1 to i32
    %c0_i32_0 = arith.constant 0 : i32
    %2 = arith.cmpi ne, %1, %c0_i32_0 : i32
    scf.if %2 {
      %cst_22 = arith.constant 0.000000e+00 : f32
      %58 = vector.broadcast %cst_22 : f32 to vector<1x3x8x128xf32>
      %c0_23 = arith.constant 0 : index
      %c0_24 = arith.constant 0 : index
      %c0_25 = arith.constant 0 : index
      %c0_26 = arith.constant 0 : index
      %59 = vector.load %arg4[%c0_23, %c0_24, %c0_25, %c0_26] : memref<1x3x8x128xf32, #tpu.memory_space<vmem>>, vector<1x3x8x128xf32>
      tpu.vector_store %arg4[%c0_23, %c0_24, %c0_25, %c0_26], %58 {strides = array<i32>} : memref<1x3x8x128xf32, #tpu.memory_space<vmem>>, vector<1x3x8x128xf32>,
    } else {
    }
    %c0 = arith.constant 0 : index
    %c0_1 = arith.constant 0 : index
    %3 = vector.load %arg2[%c0, %c0_1] : memref<16x128xf32, #tpu.memory_space<vmem>>, vector<16x128xf32>
    %c0_2 = arith.constant 0 : index
    %c0_3 = arith.constant 0 : index
    %4 = vector.load %arg3[%c0_2, %c0_3] : memref<16x128xf32, #tpu.memory_space<vmem>>, vector<16x128xf32>
    %c1_i32 = arith.constant 1 : i32
    %5 = arith.muli %arg0, %c1_i32 : i32
    %6 = arith.addi %5, %arg1 : i32
    %c16_i32 = arith.constant 16 : i32
    %7 = arith.muli %6, %c16_i32 : i32
    %8 = tpu.iota {dimensions = array<i32: 0>} : vector<16x128xi32>
    %9 = tpu.iota {dimensions = array<i32: 1>} : vector<16x128xi32>
    %10 = vector.broadcast %7 : i32 to vector<16x128xi32>
    %11 = arith.addi %10, %8 : vector<16x128xi32>
    %c128_i32 = arith.constant 128 : i32
    %12 = vector.broadcast %c128_i32 : i32 to vector<16x128xi32>
    %13 = arith.muli %11, %12 : vector<16x128xi32>
    %14 = arith.addi %13, %9 : vector<16x128xi32>
    %c2048_i32 = arith.constant 2048 : i32
    %15 = vector.broadcast %c2048_i32 : i32 to vector<16x128xi32>
    %16 = arith.cmpi slt, %14, %15 : vector<16x128xi32>
    %17 = math.absf %3 : vector<16x128xf32>
    %cst = arith.constant 0.000000e+00 : f32
    %18 = vector.broadcast %cst : f32 to vector<16x128xf32>
    %19 = arith.subf %18, %17 : vector<16x128xf32>
    %20 = math.exp %19 : vector<16x128xf32>
    %cst_4 = arith.constant 0.000000e+00 : f32
    %21 = vector.broadcast %cst_4 : f32 to vector<16x128xf32>
    %22 = arith.maximumf %3, %21 : vector<16x128xf32>
    %23 = arith.mulf %3, %4 : vector<16x128xf32>
    %24 = arith.subf %22, %23 : vector<16x128xf32>
    %25 = math.log1p %20 : vector<16x128xf32>
    %26 = arith.addf %24, %25 : vector<16x128xf32>
    %cst_5 = arith.constant 0.000000e+00 : f32
    %27 = vector.broadcast %cst_5 : f32 to vector<16x128xf32>
    %28 = arith.cmpf oge, %3, %27 : vector<16x128xf32>
    %cst_6 = arith.constant 1.000000e+00 : f32
    %29 = vector.broadcast %cst_6 : f32 to vector<16x128xf32>
    %30 = arith.select %28, %29, %20 : vector<16x128xi1>, vector<16x128xf32>
    %cst_7 = arith.constant 1.000000e+00 : f32
    %31 = vector.broadcast %cst_7 : f32 to vector<16x128xf32>
    %32 = arith.addf %31, %20 : vector<16x128xf32>
    %33 = arith.divf %30, %32 : vector<16x128xf32>
    %cst_8 = arith.constant 0.000000e+00 : f32
    %34 = vector.broadcast %cst_8 : f32 to vector<16x128xf32>
    %35 = arith.select %16, %26, %34 : vector<16x128xi1>, vector<16x128xf32>
    %cst_9 = arith.constant 0.000000e+00 : f32
    %36 = vector.broadcast %cst_9 : f32 to vector<16x128xf32>
    %37 = arith.select %16, %33, %36 : vector<16x128xi1>, vector<16x128xf32>
    %cst_10 = arith.constant 0.000000e+00 : f32
    %38 = vector.broadcast %cst_10 : f32 to vector<16x128xf32>
    %39 = arith.select %16, %4, %38 : vector<16x128xi1>, vector<16x128xf32>
    %40 = arith.mulf %37, %37 : vector<16x128xf32>
    %41 = arith.mulf %39, %39 : vector<16x128xf32>
    %42 = arith.addf %40, %41 : vector<16x128xf32>
    %43 = vector.shape_cast %35 : vector<16x128xf32> to vector<2x8x128xf32>
    %cst_11 = arith.constant dense<0.000000e+00> : vector<8x128xf32>
    %44 = vector.multi_reduction <add>, %43, %cst_11 [0] : vector<2x8x128xf32> to vector<8x128xf32>
    %45 = arith.mulf %37, %39 : vector<16x128xf32>
    %46 = vector.shape_cast %45 : vector<16x128xf32> to vector<2x8x128xf32>
    %cst_12 = arith.constant dense<0.000000e+00> : vector<8x128xf32>
    %47 = vector.multi_reduction <add>, %46, %cst_12 [0] : vector<2x8x128xf32> to vector<8x128xf32>
    %48 = vector.shape_cast %42 : vector<16x128xf32> to vector<2x8x128xf32>
    %cst_13 = arith.constant dense<0.000000e+00> : vector<8x128xf32>
    %49 = vector.multi_reduction <add>, %48, %cst_13 [0] : vector<2x8x128xf32> to vector<8x128xf32>
    %50 = vector.shape_cast %44 : vector<8x128xf32> to vector<1x8x128xf32>
    %51 = vector.shape_cast %47 : vector<8x128xf32> to vector<1x8x128xf32>
    %52 = vector.shape_cast %49 : vector<8x128xf32> to vector<1x8x128xf32>
    %53 = tpu.concatenate %50, %51, %52 in 0 : vector<1x8x128xf32>, vector<1x8x128xf32>, vector<1x8x128xf32> -> vector<3x8x128xf32>
    %c0_14 = arith.constant 0 : index
    %c0_15 = arith.constant 0 : index
    %c0_16 = arith.constant 0 : index
    %c0_17 = arith.constant 0 : index
    %54 = vector.load %arg4[%c0_14, %c0_15, %c0_16, %c0_17] : memref<1x3x8x128xf32, #tpu.memory_space<vmem>>, vector<1x3x8x128xf32>
    %55 = vector.shape_cast %53 : vector<3x8x128xf32> to vector<1x3x8x128xf32>
    %56 = arith.addf %54, %55 : vector<1x3x8x128xf32>
    %c0_18 = arith.constant 0 : index
    %c0_19 = arith.constant 0 : index
    %c0_20 = arith.constant 0 : index
    %c0_21 = arith.constant 0 : index
    %57 = vector.load %arg4[%c0_18, %c0_19, %c0_20, %c0_21] : memref<1x3x8x128xf32, #tpu.memory_space<vmem>>, vector<1x3x8x128xf32>
    tpu.vector_store %arg4[%c0_18, %c0_19, %c0_20, %c0_21], %56 {strides = array<i32>} : memref<1x3x8x128xf32, #tpu.memory_space<vmem>>, vector<1x3x8x128xf32>,
    return
  }
  func.func @transform_0(%arg0: i32, %arg1: i32) -> (i32, i32) {
    %c1_i32 = arith.constant 1 : i32
    %0 = arith.muli %arg0, %c1_i32 : i32
    %1 = arith.addi %0, %arg1 : i32
    %c0_i32 = arith.constant 0 : i32
    %2 = arith.minsi %1, %c0_i32 : i32
    %c0_i32_0 = arith.constant 0 : i32
    %c0_i32_1 = arith.constant 0 : i32
    return %2, %c0_i32_0 : i32, i32
  }
  func.func @transform_1(%arg0: i32, %arg1: i32) -> (i32, i32) {
    %c1_i32 = arith.constant 1 : i32
    %0 = arith.muli %arg0, %c1_i32 : i32
    %1 = arith.addi %0, %arg1 : i32
    %c0_i32 = arith.constant 0 : i32
    %2 = arith.minsi %1, %c0_i32 : i32
    %c0_i32_0 = arith.constant 0 : i32
    %c0_i32_1 = arith.constant 0 : i32
    return %2, %c0_i32_0 : i32, i32
  }
  func.func @transform_2(%arg0: i32, %arg1: i32) -> (i32, i32, i32, i32) {
    %c0_i32 = arith.constant 0 : i32
    %c0_i32_0 = arith.constant 0 : i32
    %c0_i32_1 = arith.constant 0 : i32
    %c0_i32_2 = arith.constant 0 : i32
    return %arg0, %c0_i32, %c0_i32_0, %c0_i32_1 : i32, i32, i32, i32
  }
}

</mosaic_0001>

<bundles_post_ra>
// kernel: dice_bce_with_logits_loss.1
= control target key start
LH: loop header
LB: loop body
LE: loop exit
PB: predicated region body
PF: predicated region fallthrough
CT: control target
= control target key end

     0   :  { %s484_s9 = smov 0   ;;  %s486_s10 = smov 0   ;;  %s544_s0 = inlined_call_operand.vmem [shape: f32[16,128], index: 0, kind: input, shape index: {}]   ;;  %s545_s1 = inlined_call_operand.vmem [shape: f32[16,128], index: 1, kind: input, shape index: {}]   ;;  %s546_s2 = inlined_call_operand.vmem [shape: f32[2,3,8,128], index: 2, kind: output, shape index: {}]  }
   0x1   :  { %s488_s11 = smov 0  }
   0x2 LB: > { %s24_s12 = sadd.s32 1, %s463_s10  ;;  %p398_p0 = scmp.ge.s32.totalorder %s467_s11, 1  ;;  %s467_s11 = sphi %s488_s11, %s12_s11   ;;  %s463_s10 = sphi %s486_s10, %s550_s10   ;;  %s459_s9 = sphi %s484_s9, %s549_s9  }
   0x3   : > { %p26_p1 = scmp.ge.s32.totalorder %s24_s12, 2  ;;  %p160_p2 = scmp.lt.s32.totalorder %s467_s11, 3 }
   0x5   : > { %s552_s12 = smov (%p26_p1, %s24_s12), 0  ;;  %p161_p3 = pnand %p398_p0, %p160_p2 }
   0x6   : > { %p194_p4 = scmp.lt.s32.totalorder (!%p161_p3), %s459_s9, 0  ;;  %v235_v6 = vlaneseq (!%p161_p3)  ;;  %s404_s19 = sshll.u32 (!%p161_p3), %s459_s9, 4 }
   0x7   : > { %164 = sbr.rel (%p161_p3) target bundleno = 66 (0x42), region = 28  ;;  %v240_v10 = vstv (!%p161_p3), %s404_s19  ;;  %p217_p6 = scmp.lt.s32.totalorder (!%p161_p3), %s459_s9, 1 }
   0x8   : > { %v236_v9 = vshrl.u32 (!%p161_p3), %v235_v6, 7  ;;  %v239_v16 = vand.u32 (!%p161_p3), 127, %v235_v6 }
   0xa   : > { %v237_v11 = vadd.s32 (!%p161_p3), 8, %v236_v9  ;;  %v241_v12 = vadd.s32 (!%p161_p3), %v240_v10, %v236_v9 }
   0xc   : > { %v242_v14 = vadd.s32 (!%p161_p3), %v240_v10, %v237_v11  ;;  %v243_v17 = vmul.u32 (!%p161_p3), 128, %v241_v12 }
   0xe   : > { %s195_s13 = scalar_select %p194_p4, %s459_s9, 0  ;;  %v244_v20 = vmul.u32 128, %v242_v14  ;;  %v245_v23 = vadd.s32 %v243_v17, %v239_v16 }
   0xf   : > { %s556_s9 = smov (!%p217_p6, %s459_s9), 1 }
  0x10   : > { %s399_s14 = sshll.u32 %s195_s13, 1  ;;  %v246_v26 = vadd.s32 %v244_v20, %v239_v16  ;;  %vm247_vm0 = vcmp.lt.s32.totalorder %v245_v23, 2048  ;;  %s407_s23 = smul.u32 24, %s556_s9 }
  0x11   : > { %p197_p5 = scmp.lt.s32.totalorder %s399_s14, 1 }
  0x12   : > { %vm248_vm3 = vcmp.lt.s32.totalorder %v246_v26, 2048  ;;  %s221_s26 = scalar_lea.vmem %s546_s2, %s407_s23 }
  0x13   : > { %s554_s14 = smov (!%p197_p5, %s399_s14), 1 }
  0x14   : > { %s400_s15 = sshll.u32 %s554_s14, 3 }
  0x15   : > { %s200_s18 = scalar_lea.vmem %s544_s0, %s400_s15  ;;  %s212_s22 = scalar_lea.vmem %s545_s1, %s400_s15 }
  0x16   : > { %v229_v0 = vld [vmem:[%s200_s18] sm:$0xff]  ;;  %v230_v1 = vld [vmem:[%s200_s18 + $0x8] sm:$0xff] }
  0x17   : > { %v249_v2 = vand.u32 2147483647, %v229_v0  ;;  %v250_v3 = vand.u32 2147483647, %v230_v1  ;;  %v231_v22 = vld [vmem:[%s212_s22] sm:$0xff]  ;;  %v232_v25 = vld [vmem:[%s212_s22 + $0x8] sm:$0xff] }
  0x18   : > { %v257_v27 = vmax.f32 %v229_v0, 0.0  ;;  %v259_v28 = vmul.f32 %v231_v22, %v229_v0  ;;  %v258_v32 = vmax.f32 %v230_v1, 0.0  ;;  %v260_v33 = vmul.f32 %v232_v25, %v230_v1 }
  0x19   : > { %v251_v4 = vsub.f32 0.0, %v249_v2  ;;  %v252_v5 = vsub.f32 0.0, %v250_v3  ;;  %vm283_vm1 = vcmp.ge.f32.partialorder %v229_v0, 0.0  ;;  %vm284_vm2 = vcmp.ge.f32.partialorder %v230_v1, 0.0 }
  0x1a   : > { %v261_v35 = vsub.f32 %v257_v27, %v259_v28  ;;  %v297_v41 = vsel %vm247_vm0, %v231_v22, 0.0  ;;  %v262_v43 = vsub.f32 %v258_v32, %v260_v33  ;;  %v298_v48 = vsel %vm248_vm3, %v232_v25, 0.0 }
  0x1b   : > { %v253_v7 = vmul.f32 1.442695, %v251_v4  ;;  %v255_v8 = vmul.f32 1.442695, %v252_v5  ;;  %v301_v55 = vmul.f32 %v297_v41, %v297_v41  ;;  %v302_v58 = vmul.f32 %v298_v48, %v298_v48 }
  0x1d   : > { %433 = vpow2.f32 %v253_v7 }
  0x1e   : > { %435 = vpow2.f32 %v255_v8 }
  0x27   : > { %v434_v13 = vpop.eup %433 }
  0x28   : > { %v436_v15 = vpop.eup %435  ;;  %v263_v18 = vadd.f32 1.0, %v434_v13  ;;  %v266_v21 = vmul.f32 -0.5, %v434_v13  ;;  %v269_v30 = vand.u32 2147483647, %v434_v13  ;;  %v285_v40 = vsel %vm283_vm1, 1.0, %v434_v13 }
  0x29   : > { %v272_v19 = vadd.f32 1.0, %v436_v15  ;;  %v275_v24 = vmul.f32 -0.5, %v436_v15  ;;  %v278_v34 = vand.u32 2147483647, %v436_v15  ;;  %v286_v45 = vsel %vm284_vm2, 1.0, %v436_v15 }
  0x2a   : > { %437 = vlog2.f32 %v263_v18  ;;  %v267_v29 = vadd.f32 1.0, %v266_v21  ;;  %vm514_vm4 = vcmp.lt.f32.partialorder %v269_v30, 0.0004427343 }
  0x2b   : > { %439 = vlog2.f32 %v272_v19  ;;  %v276_v31 = vadd.f32 1.0, %v275_v24  ;;  %vm279_vm5 = vcmp.lt.f32.partialorder %v278_v34, 0.0004427343 }
  0x2c   : > { %441 = vrcp.f32 %v263_v18  ;;  %v268_v36 = vmul.f32 %v434_v13, %v267_v29 }
  0x2d   : > { %443 = vrcp.f32 %v272_v19  ;;  %v277_v39 = vmul.f32 %v436_v15, %v276_v31 }
  0x34   : > { %v438_v37 = vpop.eup %437 }
  0x35   : > { %v440_v42 = vpop.eup %439  ;;  %v265_v44 = vmul.f32 0.6931472, %v438_v37 }
  0x36   : > { %v442_v46 = vpop.eup %441  ;;  %v274_v47 = vmul.f32 0.6931472, %v440_v42 }
  0x37   : > { %v444_v49 = vpop.eup %443  ;;  %v271_v50 = vsel %vm514_vm4, %v268_v36, %v265_v44  ;;  %v290_v51 = vmul.f32 %v442_v46, %v285_v40 }
  0x38   : > { %v280_v52 = vsel %vm279_vm5, %v277_v39, %v274_v47  ;;  %v281_v53 = vadd.f32 %v271_v50, %v261_v35  ;;  %v292_v54 = vmul.f32 %v444_v49, %v286_v45 }
  0x39   : > { %v282_v56 = vadd.f32 %v280_v52, %v262_v43  ;;  %v295_v57 = vsel %vm247_vm0, %v290_v51, 0.0 }
  0x3a   : > { %v293_v59 = vsel %vm247_vm0, %v281_v53, 0.0  ;;  %v296_v60 = vsel %vm248_vm3, %v292_v54, 0.0  ;;  %v306_v61 = vmul.f32 %v297_v41, %v295_v57  ;;  %v299_v62 = vmul.f32 %v295_v57, %v295_v57 }
  0x3b   : > { %v294_v63 = vsel %vm248_vm3, %v282_v56, 0.0  ;;  %v307_v0 = vmul.f32 %v298_v48, %v296_v60  ;;  %v300_v1 = vmul.f32 %v296_v60, %v296_v60 }
  0x3c   : > { %v305_v2 = vadd.f32 %v294_v63, %v293_v59  ;;  %v303_v3 = vadd.f32 %v301_v55, %v299_v62 }
  0x3d   : > { %v308_v4 = vadd.f32 %v307_v0, %v306_v61  ;;  %v304_v5 = vadd.f32 %v302_v58, %v300_v1 }
  0x3e   : > { %316 = vst [vmem:[%s221_s26] sm:$0xff] %v305_v2 }
  0x3f   : > { %v309_v6 = vadd.f32 %v304_v5, %v303_v3  ;;  %317 = vst [vmem:[%s221_s26 + $0x8] sm:$0xff] %v308_v4 }
  0x41   : > { %318 = vst [vmem:[%s221_s26 + $0x10] sm:$0xff] %v309_v6 }
  0x42 PF: > { %s12_s11 = sadd.s32 1, %s467_s11   ;;  %s549_s9 = smov %s463_s10 }
  0x43   : > { %p9_p7 = scmp.ge.s32.totalorder %s12_s11, 4   ;;  %s550_s10 = smov %s552_s12 }
  0x45   :  { %11 = sbr.rel (!%p9_p7) target bundleno = 2 (0x2), region = 65 }

</bundles_post_ra>
